<compile_context>
chip_gen: v5e
topology: v5e:2x2
jax: 0.10.0
libtpu: 0.0.40
codegen_flags: <defaults>
</compile_context>

<pallas_src>
import functools

import jax
import jax.numpy as jnp
import numpy as np
from jax.experimental import pallas as pl
from jax.experimental.pallas import tpu as pltpu

HIDDEN = 128   # dist_feature hidden width (fixed by the module: Linear(128,128))
LANE = 128     # TPU lane width; action dim is padded up to this


def _proposal_kernel(x_ref, w1_ref, b1_ref, w2_ref, b2_ref, sig_ref,
                     eps_ref, uni_ref, out_ref, *, n_uniform, use_bf16):
    """One batch tile: MLP -> mu, then fused [uniform ; mu + sigma*eps]."""
    x = x_ref[...]                      # [TB, 128]
    w1 = w1_ref[...]                    # [128, 128]
    w2 = w2_ref[...]                    # [128, 128]  (lane-padded)
    if use_bf16:                        # optional bf16 MXU path (v6e/v7x)
        x, w1, w2 = (x.astype(jnp.bfloat16), w1.astype(jnp.bfloat16),
                     w2.astype(jnp.bfloat16))

    # dist_feature: Linear(128,128) -> ReLU -> Linear(128, A_padded)
    h = jnp.dot(x, w1, preferred_element_type=jnp.float32)           # MXU
    h = jnp.maximum(h + b1_ref[...], 0.0)                            # VPU (f32)
    if use_bf16:
        h = h.astype(jnp.bfloat16)
    mu = jnp.dot(h, w2, preferred_element_type=jnp.float32)          # MXU
    mu = mu + b2_ref[...]                                            # [TB, 128]

    # Fused torch.cat([a_uniform, a_dist], dim=1):
    out_ref[:, :n_uniform, :] = uni_ref[...]                         # [TB, U, 128]
    # MVN(mu, diag(action_var)) samples == mu + sqrt(action_var) * eps
    # (single hoisted broadcast; per-lane sigma handles vector action_var)
    out_ref[:, n_uniform:, :] = mu[:, None, :] + eps_ref[...] * sig_ref[...]


def _pick_batch_tile(b):
    """Largest nice tile dividing b (8-aligned when possible)."""
    for tb in (512, 256, 128, 64, 32, 16, 8):
        if b % tb == 0:
            return tb
    return b  # tiny batch: single whole-array block (full-dim block is legal)


def proposal_forward(embed_state, params, eps, a_uniform, action_var,
                     *, use_bf16_matmul=False):
    """Pallas-backed forward pass of Proposal_Network (continuous branch).

    embed_state: [B, 128] f32
    params:      (w1 [128,128], b1 [128], w2 [128,A], b2 [A])  (stored [in,out])
    eps:         [B, P, A] standard-normal noise for the MVN proposals
    a_uniform:   [B, U, A] uniform proposals over the action box
    action_var:  scalar or [A] diagonal variance
    returns:     [B, U+P, A] == torch.cat([a_uniform, a_dist], dim=1)
    """
    w1, b1, w2, b2 = params
    B, H = embed_state.shape
    assert H == HIDDEN
    P, A = eps.shape[1], eps.shape[2]
    U = a_uniform.shape[1]
    S = U + P
    assert A <= LANE, "action dim larger than one lane tile not supported"
    pad_a = LANE - A

    f32 = jnp.float32
    x = embed_state.astype(f32)
    w1f = w1.astype(f32)
    b1r = b1.astype(f32).reshape(1, HIDDEN)

    # Lane-pad the action-dim operands to 128 so all loads/stores are dense.
    w2p = jnp.pad(w2.astype(f32), ((0, 0), (0, pad_a)))               # [128,128]
    b2p = jnp.pad(b2.astype(f32).reshape(1, A), ((0, 0), (0, pad_a)))  # [1,128]
    sigma = jnp.sqrt(jnp.broadcast_to(jnp.asarray(action_var, f32), (A,)))
    sigp = jnp.pad(sigma.reshape(1, A), ((0, 0), (0, pad_a)))          # [1,128]
    epsp = jnp.pad(eps.astype(f32), ((0, 0), (0, 0), (0, pad_a)))      # [B,P,128]
    unip = jnp.pad(a_uniform.astype(f32), ((0, 0), (0, 0), (0, pad_a)))  # [B,U,128]

    TB = _pick_batch_tile(B)
    grid = (B // TB,)

    # VMEM budget: double-buffered per-tile x/eps/uniform/out + resident weights.
    per_step_elems = TB * HIDDEN + TB * P * LANE + TB * U * LANE + TB * S * LANE
    vmem_bytes = 4 * (2 * per_step_elems + 2 * HIDDEN * LANE + 4 * LANE)
    vmem_limit = int(min(max(2 * vmem_bytes, 4 * 2**20), 64 * 2**20))

    kernel = functools.partial(_proposal_kernel, n_uniform=U,
                               use_bf16=use_bf16_matmul)
    vmem = pltpu.MemorySpace.VMEM

    out_padded = pl.pallas_call(
        kernel,
        out_shape=jax.ShapeDtypeStruct((B, S, LANE), f32),
        grid=grid,
        in_specs=[
            pl.BlockSpec((TB, HIDDEN), lambda i: (i, 0), memory_space=vmem),      # x
            pl.BlockSpec((HIDDEN, HIDDEN), lambda i: (0, 0), memory_space=vmem),  # w1
            pl.BlockSpec((1, HIDDEN), lambda i: (0, 0), memory_space=vmem),       # b1
            pl.BlockSpec((HIDDEN, LANE), lambda i: (0, 0), memory_space=vmem),    # w2 (padded)
            pl.BlockSpec((1, LANE), lambda i: (0, 0), memory_space=vmem),         # b2 (padded)
            pl.BlockSpec((1, LANE), lambda i: (0, 0), memory_space=vmem),         # sigma (padded)
            pl.BlockSpec((TB, P, LANE), lambda i: (i, 0, 0), memory_space=vmem),  # eps (padded)
            pl.BlockSpec((TB, U, LANE), lambda i: (i, 0, 0), memory_space=vmem),  # uniform (padded)
        ],
        out_specs=pl.BlockSpec((TB, S, LANE), lambda i: (i, 0, 0),
                               memory_space=vmem),
        compiler_params=pltpu.CompilerParams(
            dimension_semantics=("parallel",),
            vmem_limit_bytes=vmem_limit),
    )(x, w1f, b1r, w2p, b2p, sigp, epsp, unip)

    # Slice the lane padding back off: [B, U+P, A]
    return out_padded[:, :, :A]


if __name__ == "__main__":
    key = jax.random.PRNGKey(0)
    B = 2                  # batch of embedded states (small test; kernel scales via grid)
    A = 4                  # num_actions (Box action space, shape (4,))
    P = 8                  # propose_sample (kept small)
    U = 8                  # uniform_sample (kept small)
    action_var = 0.25      # scalar here; per-dimension vector also supported
    low, high = -1.0, 1.0  # env.action_space.low / high

    k_x, k_w1, k_w2, k_eps, k_uni = jax.random.split(key, 5)

    # Orthogonal init with gain = calculate_gain('relu') = sqrt(2), biases zero
    # (matches init_/init in the PyTorch module).
    ortho = jax.nn.initializers.orthogonal(scale=float(np.sqrt(2.0)))
    w1 = ortho(k_w1, (HIDDEN, HIDDEN), jnp.float32)   # stored as [in, out]
    b1 = jnp.zeros((HIDDEN,), jnp.float32)
    w2 = ortho(k_w2, (HIDDEN, A), jnp.float32)
    b2 = jnp.zeros((A,), jnp.float32)

    embed_state = jax.random.normal(k_x, (B, HIDDEN), jnp.float32)

    # Standard-normal noise for the MVN proposals and uniform box proposals.
    eps = jax.random.normal(k_eps, (B, P, A), jnp.float32)
    a_uniform = jax.random.uniform(k_uni, (B, U, A), jnp.float32,
                                   minval=low, maxval=high)

    a_mu = proposal_forward(embed_state, (w1, b1, w2, b2), eps, a_uniform,
                            action_var)
    a_mu = jax.block_until_ready(a_mu)

    # Pure-JAX reference of the same forward pass.
    h_ref = jnp.maximum(embed_state @ w1 + b1, 0.0)
    mu_ref = h_ref @ w2 + b2
    a_dist_ref = mu_ref[:, None, :] + eps * jnp.sqrt(jnp.float32(action_var))
    ref = jnp.concatenate([a_uniform, a_dist_ref], axis=1)

    assert a_mu.shape == (B, U + P, A), a_mu.shape
    assert a_mu.dtype == jnp.float32
    assert bool(jnp.all(jnp.isfinite(a_mu)))
    np.testing.assert_allclose(np.asarray(a_mu), np.asarray(ref),
                               rtol=1e-5, atol=1e-5)
    print("KERNEL_OK")
</pallas_src>

<mosaic_0001>
module attributes {stable_mosaic.version = 11 : i64} {
  func.func @_proposal_kernel(%arg0: i32, %arg1: memref<2x128xf32, #tpu.memory_space<vmem>>, %arg2: memref<128x128xf32, #tpu.memory_space<vmem>>, %arg3: memref<1x128xf32, #tpu.memory_space<vmem>>, %arg4: memref<128x128xf32, #tpu.memory_space<vmem>>, %arg5: memref<1x128xf32, #tpu.memory_space<vmem>>, %arg6: memref<1x128xf32, #tpu.memory_space<vmem>>, %arg7: memref<2x8x128xf32, #tpu.memory_space<vmem>>, %arg8: memref<2x8x128xf32, #tpu.memory_space<vmem>>, %arg9: memref<2x16x128xf32, #tpu.memory_space<vmem>>) attributes {dimension_semantics = [#tpu.dimension_semantics<parallel>], iteration_bounds = array<i64: 1>, scalar_prefetch = 0 : i64, scratch_operands = 0 : i64, tpu.core_type = #tpu.core_type<tc>, window_params = [{transform_indices = @transform_0, window_bounds = array<i64: 2, 128>}, {pipeline_mode = #tpu.pipeline_mode<synchronous>, transform_indices = @transform_1, window_bounds = array<i64: 128, 128>}, {pipeline_mode = #tpu.pipeline_mode<synchronous>, transform_indices = @transform_2, window_bounds = array<i64: 1, 128>}, {pipeline_mode = #tpu.pipeline_mode<synchronous>, transform_indices = @transform_3, window_bounds = array<i64: 128, 128>}, {pipeline_mode = #tpu.pipeline_mode<synchronous>, transform_indices = @transform_4, window_bounds = array<i64: 1, 128>}, {pipeline_mode = #tpu.pipeline_mode<synchronous>, transform_indices = @transform_5, window_bounds = array<i64: 1, 128>}, {transform_indices = @transform_6, window_bounds = array<i64: 2, 8, 128>}, {transform_indices = @transform_7, window_bounds = array<i64: 2, 8, 128>}, {transform_indices = @transform_8, window_bounds = array<i64: 2, 16, 128>}]} {
    %c0 = arith.constant 0 : index
    %c0_0 = arith.constant 0 : index
    %0 = vector.load %arg1[%c0, %c0_0] : memref<2x128xf32, #tpu.memory_space<vmem>>, vector<2x128xf32>
    %c0_1 = arith.constant 0 : index
    %c0_2 = arith.constant 0 : index
    %1 = vector.load %arg2[%c0_1, %c0_2] : memref<128x128xf32, #tpu.memory_space<vmem>>, vector<128x128xf32>
    %c0_3 = arith.constant 0 : index
    %c0_4 = arith.constant 0 : index
    %2 = vector.load %arg4[%c0_3, %c0_4] : memref<128x128xf32, #tpu.memory_space<vmem>>, vector<128x128xf32>
    %cst = arith.constant dense<0.000000e+00> : vector<2x128xf32>
    %3 = tpu.matmul %0, %1, %cst {dimension_numbers = #tpu.dot_dimension_numbers<[1], [0], [0], [1], [0, 0, 1, 1], [], []>} : vector<2x128xf32>, vector<128x128xf32>, vector<2x128xf32> -> vector<2x128xf32>
    %c0_5 = arith.constant 0 : index
    %c0_6 = arith.constant 0 : index
    %4 = vector.load %arg3[%c0_5, %c0_6] : memref<1x128xf32, #tpu.memory_space<vmem>>, vector<1x128xf32>
    %5 = vector.broadcast %4 : vector<1x128xf32> to vector<2x128xf32>
    %6 = arith.addf %3, %5 : vector<2x128xf32>
    %cst_7 = arith.constant 0.000000e+00 : f32
    %7 = vector.broadcast %cst_7 : f32 to vector<2x128xf32>
    %8 = arith.maximumf %6, %7 : vector<2x128xf32>
    %cst_8 = arith.constant dense<0.000000e+00> : vector<2x128xf32>
    %9 = tpu.matmul %8, %2, %cst_8 {dimension_numbers = #tpu.dot_dimension_numbers<[1], [0], [0], [1], [0, 0, 1, 1], [], []>} : vector<2x128xf32>, vector<128x128xf32>, vector<2x128xf32> -> vector<2x128xf32>
    %c0_9 = arith.constant 0 : index
    %c0_10 = arith.constant 0 : index
    %10 = vector.load %arg5[%c0_9, %c0_10] : memref<1x128xf32, #tpu.memory_space<vmem>>, vector<1x128xf32>
    %11 = vector.broadcast %10 : vector<1x128xf32> to vector<2x128xf32>
    %12 = arith.addf %9, %11 : vector<2x128xf32>
    %c0_11 = arith.constant 0 : index
    %c0_12 = arith.constant 0 : index
    %c0_13 = arith.constant 0 : index
    %13 = vector.load %arg8[%c0_11, %c0_12, %c0_13] : memref<2x8x128xf32, #tpu.memory_space<vmem>>, vector<2x8x128xf32>
    %c0_14 = arith.constant 0 : index
    %c0_15 = arith.constant 0 : index
    %c0_16 = arith.constant 0 : index
    %14 = vector.load %arg9[%c0_14, %c0_15, %c0_16] : memref<2x16x128xf32, #tpu.memory_space<vmem>>, vector<2x8x128xf32>
    tpu.vector_store %arg9[%c0_14, %c0_15, %c0_16], %13 {strides = array<i32>} : memref<2x16x128xf32, #tpu.memory_space<vmem>>, vector<2x8x128xf32>,
    %15 = vector.shape_cast %12 : vector<2x128xf32> to vector<2x1x128xf32>
    %c0_17 = arith.constant 0 : index
    %c0_18 = arith.constant 0 : index
    %c0_19 = arith.constant 0 : index
    %16 = vector.load %arg7[%c0_17, %c0_18, %c0_19] : memref<2x8x128xf32, #tpu.memory_space<vmem>>, vector<2x8x128xf32>
    %c0_20 = arith.constant 0 : index
    %c0_21 = arith.constant 0 : index
    %17 = vector.load %arg6[%c0_20, %c0_21] : memref<1x128xf32, #tpu.memory_space<vmem>>, vector<1x128xf32>
    %18 = vector.shape_cast %17 : vector<1x128xf32> to vector<1x1x128xf32>
    %19 = vector.broadcast %18 : vector<1x1x128xf32> to vector<2x8x128xf32>
    %20 = arith.mulf %16, %19 : vector<2x8x128xf32>
    %21 = vector.broadcast %15 : vector<2x1x128xf32> to vector<2x8x128xf32>
    %22 = arith.addf %21, %20 : vector<2x8x128xf32>
    %c0_22 = arith.constant 0 : index
    %c8 = arith.constant 8 : index
    %c0_23 = arith.constant 0 : index
    %23 = vector.load %arg9[%c0_22, %c8, %c0_23] : memref<2x16x128xf32, #tpu.memory_space<vmem>>, vector<2x8x128xf32>
    tpu.vector_store %arg9[%c0_22, %c8, %c0_23], %22 {strides = array<i32>} : memref<2x16x128xf32, #tpu.memory_space<vmem>>, vector<2x8x128xf32>,
    return
  }
  func.func @transform_0(%arg0: i32) -> (i32, i32) {
    %c0_i32 = arith.constant 0 : i32
    %c0_i32_0 = arith.constant 0 : i32
    return %arg0, %c0_i32 : i32, i32
  }
  func.func @transform_1(%arg0: i32) -> (i32, i32) {
    %c0_i32 = arith.constant 0 : i32
    %c0_i32_0 = arith.constant 0 : i32
    %c0_i32_1 = arith.constant 0 : i32
    return %c0_i32, %c0_i32_0 : i32, i32
  }
  func.func @transform_2(%arg0: i32) -> (i32, i32) {
    %c0_i32 = arith.constant 0 : i32
    %c0_i32_0 = arith.constant 0 : i32
    %c0_i32_1 = arith.constant 0 : i32
    return %c0_i32, %c0_i32_0 : i32, i32
  }
  func.func @transform_3(%arg0: i32) -> (i32, i32) {
    %c0_i32 = arith.constant 0 : i32
    %c0_i32_0 = arith.constant 0 : i32
    %c0_i32_1 = arith.constant 0 : i32
    return %c0_i32, %c0_i32_0 : i32, i32
  }
  func.func @transform_4(%arg0: i32) -> (i32, i32) {
    %c0_i32 = arith.constant 0 : i32
    %c0_i32_0 = arith.constant 0 : i32
    %c0_i32_1 = arith.constant 0 : i32
    return %c0_i32, %c0_i32_0 : i32, i32
  }
  func.func @transform_5(%arg0: i32) -> (i32, i32) {
    %c0_i32 = arith.constant 0 : i32
    %c0_i32_0 = arith.constant 0 : i32
    %c0_i32_1 = arith.constant 0 : i32
    return %c0_i32, %c0_i32_0 : i32, i32
  }
  func.func @transform_6(%arg0: i32) -> (i32, i32, i32) {
    %c0_i32 = arith.constant 0 : i32
    %c0_i32_0 = arith.constant 0 : i32
    %c0_i32_1 = arith.constant 0 : i32
    return %arg0, %c0_i32, %c0_i32_0 : i32, i32, i32
  }
  func.func @transform_7(%arg0: i32) -> (i32, i32, i32) {
    %c0_i32 = arith.constant 0 : i32
    %c0_i32_0 = arith.constant 0 : i32
    %c0_i32_1 = arith.constant 0 : i32
    return %arg0, %c0_i32, %c0_i32_0 : i32, i32, i32
  }
  func.func @transform_8(%arg0: i32) -> (i32, i32, i32) {
    %c0_i32 = arith.constant 0 : i32
    %c0_i32_0 = arith.constant 0 : i32
    %c0_i32_1 = arith.constant 0 : i32
    return %arg0, %c0_i32, %c0_i32_0 : i32, i32, i32
  }
}

</mosaic_0001>

<bundles_post_ra>
// kernel: tpu_custom_call.1
= control target key start
LH: loop header
LB: loop body
LE: loop exit
PB: predicated region body
PF: predicated region fallthrough
CT: control target
= control target key end

     0   :  { %13 = vsyncpa [#allocation3], 0  ;;  %s489_s0 = inlined_call_operand.hbm [shape: f32[2,128], index: 0, kind: input, shape index: {}]   ;;  %s490_s1 = inlined_call_operand.hbm [shape: f32[128,128], index: 1, kind: input, shape index: {}]   ;;  %s491_s2 = inlined_call_operand.vmem [shape: f32[1,128], index: 2, kind: input, shape index: {}]   ;;  %s492_s3 = inlined_call_operand.hbm [shape: f32[128,128], index: 3, kind: input, shape index: {}]   ;;  %s493_s4 = inlined_call_operand.vmem [shape: f32[1,128], index: 4, kind: input, shape index: {}]   ;;  %s494_s5 = inlined_call_operand.vmem [shape: f32[1,128], index: 5, kind: input, shape index: {}]   ;;  %s495_s6 = inlined_call_operand.hbm [shape: f32[2,8,128], index: 6, kind: input, shape index: {}]   ;;  %s496_s7 = inlined_call_operand.hbm [shape: f32[2,8,128], index: 7, kind: input, shape index: {}]   ;;  %s497_s8 = inlined_call_operand.hbm [shape: f32[2,16,128], index: 8, kind: output, shape index: {}]  }
   0x1   :  { %14 = vsyncpa [#allocation6], 0 }
   0x2   :  { %15 = vsyncpa [#allocation9], 0  ;;  %s32_s29 = sshll.u32 %s490_s1, 4  ;;  %s33_s29 = int_to_ptr.hbm [resolvable:$true] %s32_s29 }
   0x3   :  { %16 = vsyncpa [#allocation4], 0  ;;  %s394_s30 = smov [#allocation5]   ;;  %s64_s12 = sshll.u32 %s495_s6, 4  ;;  %s65_s12 = int_to_ptr.hbm [resolvable:$true] %s64_s12 }
   0x4   :  { %s34_s9 = sshll.u32 %s394_s30, 4  ;;  %s395_s13 = smov 128   ;;  %s35_s9 = int_to_ptr.vmem [resolvable:$true] %s34_s9 }
   0x5   :  { %s396_s14 = smov 8   ;;  %s397_s15 = smov [#allocation8]  }
   0x6   :  { %40 = dma.hbm_to_vmem [thread:$0]  %s33_s29, 2048, %s35_s9, [#allocation6], %s395_s13, %s395_s13, %s396_s14  }
   0x7   :  { %s66_s16 = sshll.u32 %s397_s15, 4  ;;  %s22_s18 = sshll.u32 %s489_s0, 4  ;;  %s67_s16 = int_to_ptr.vmem [resolvable:$true] %s66_s16  ;;  %s23_s18 = int_to_ptr.hbm [resolvable:$true] %s22_s18 }
   0x8   :  { %72 = dma.hbm_to_vmem [thread:$0]  %s65_s12, 256, %s67_s16, [#allocation9], %s395_s13, %s395_s13, %s396_s14  }
   0x9   :  { %s47_s20 = sshll.u32 %s492_s3, 4  ;;  %s398_s21 = smov [#allocation2]   ;;  %s48_s20 = int_to_ptr.hbm [resolvable:$true] %s47_s20 }
   0xa   :  { %s24_s22 = sshll.u32 %s398_s21, 4  ;;  %s399_s23 = smov [#allocation7]   ;;  %s25_s22 = int_to_ptr.vmem [resolvable:$true] %s24_s22 }
   0xb   :  { %27 = dma.hbm_to_vmem [thread:$0]  %s23_s18, 32, %s25_s22, [#allocation3]  }
   0xc   :  { %s49_s24 = sshll.u32 %s399_s23, 4  ;;  %s77_s0 = sshll.u32 %s496_s7, 4  ;;  %s50_s24 = int_to_ptr.vmem [resolvable:$true] %s49_s24  ;;  %s78_s0 = int_to_ptr.hbm [resolvable:$true] %s77_s0 }
   0xd   :  { %55 = dma.hbm_to_vmem [thread:$0]  %s48_s20, 2048, %s50_s24, [#allocation6], %s395_s13, %s395_s13, %s396_s14  }
   0xe   :  { %s400_s27 = smov [#allocation10]  }
   0xf   :  { %s79_s28 = sshll.u32 %s400_s27, 4  ;;  %s80_s28 = int_to_ptr.vmem [resolvable:$true] %s79_s28 }
  0x10   :  { %85 = dma.hbm_to_vmem [thread:$0]  %s78_s0, 256, %s80_s28, [#allocation9], %s395_s13, %s395_s13, %s396_s14  }
  0x11   :  { %386 = dma.done.wait [#allocation3], 32  }
  0x12   :  { %387 = vsyncadd [#allocation3], 4294967264 }
  0x13   :  { %388 = dma.done.wait [#allocation6], 4096  }
  0x14   :  { %389 = vsyncadd [#allocation6], 4294963200 }
  0x15   :  { %390 = dma.done.wait [#allocation9], 512  }
  0x16   :  { %391 = vsyncadd [#allocation9], 4294966784  ;;  %v122_v0 = vld [vmem:[#allocation5 + $0x78] sm:$0xff]  ;;  %v121_v1 = vld [vmem:[#allocation5 + $0x70] sm:$0xff]  ;;  %s216_s16 = sshll.u32 %s497_s8, 4  ;;  %s217_s16 = int_to_ptr.hbm [resolvable:$true] %s216_s16 }
  0x17   :  { %143 = vmatpush.msra.mxu0 %v122_v0  ;;  %v120_v2 = vld [vmem:[#allocation5 + $0x68] sm:$0xff]  ;;  %v119_v3 = vld [vmem:[#allocation5 + $0x60] sm:$0xff]  ;;  %v138_v4 = vld [vmem:[#allocation7 + $0x78] sm:$0xff] }
  0x18   :  { %v118_v5 = vld [vmem:[#allocation5 + $0x58] sm:$0xff]  ;;  %168 = vmatpush.msra.mxu1 %v138_v4  ;;  %v137_v6 = vld [vmem:[#allocation7 + $0x70] sm:$0xff]  ;;  %v136_v7 = vld [vmem:[#allocation7 + $0x68] sm:$0xff] }
  0x19   :  { %144 = vmatpush.msra.mxu0 %v121_v1  ;;  %v117_v8 = vld [vmem:[#allocation5 + $0x50] sm:$0xff]  ;;  %v135_v9 = vld [vmem:[#allocation7 + $0x60] sm:$0xff]  ;;  %v116_v10 = vld [vmem:[#allocation5 + $0x48] sm:$0xff] }
  0x1a   :  { %169 = vmatpush.msra.mxu1 %v137_v6  ;;  %v134_v11 = vld [vmem:[#allocation7 + $0x58] sm:$0xff]  ;;  %v115_v12 = vld [vmem:[#allocation5 + $0x40] sm:$0xff]  ;;  %v133_v13 = vld [vmem:[#allocation7 + $0x50] sm:$0xff] }
  0x1b   :  { %145 = vmatpush.msra.mxu0 %v120_v2  ;;  %v114_v14 = vld [vmem:[#allocation5 + $0x38] sm:$0xff]  ;;  %v132_v15 = vld [vmem:[#allocation7 + $0x48] sm:$0xff]  ;;  %v113_v16 = vld [vmem:[#allocation5 + $0x30] sm:$0xff] }
  0x1c   :  { %170 = vmatpush.msra.mxu1 %v136_v7  ;;  %v131_v17 = vld [vmem:[#allocation7 + $0x40] sm:$0xff]  ;;  %v112_v18 = vld [vmem:[#allocation5 + $0x28] sm:$0xff]  ;;  %v130_v19 = vld [vmem:[#allocation7 + $0x38] sm:$0xff] }
  0x1d   :  { %146 = vmatpush.msra.mxu0 %v119_v3  ;;  %v111_v20 = vld [vmem:[#allocation5 + $0x20] sm:$0xff]  ;;  %v129_v21 = vld [vmem:[#allocation7 + $0x30] sm:$0xff]  ;;  %v110_v22 = vld [vmem:[#allocation5 + $0x18] sm:$0xff] }
  0x1e   :  { %171 = vmatpush.msra.mxu1 %v135_v9  ;;  %v128_v23 = vld [vmem:[#allocation7 + $0x28] sm:$0xff]  ;;  %v109_v24 = vld [vmem:[#allocation5 + $0x10] sm:$0xff]  ;;  %v127_v25 = vld [vmem:[#allocation7 + $0x20] sm:$0xff] }
  0x1f   :  { %147 = vmatpush.msra.mxu0 %v118_v5  ;;  %v108_v26 = vld [vmem:[#allocation5 + $0x8] sm:$0xff]  ;;  %v126_v27 = vld [vmem:[#allocation7 + $0x18] sm:$0xff]  ;;  %v107_v28 = vld [vmem:[#allocation5] sm:$0xff] }
  0x20   :  { %172 = vmatpush.msra.mxu1 %v134_v11  ;;  %v106_v29 = vld [vmem:[#allocation2] sm:$0x3]  ;;  %v125_v30 = vld [vmem:[#allocation7 + $0x10] sm:$0xff]  ;;  %v124_v31 = vld [vmem:[#allocation7 + $0x8] sm:$0xff] }
  0x21   :  { %148 = vmatpush.msra.mxu0 %v117_v8  ;;  %v123_v32 = vld [vmem:[#allocation7] sm:$0xff]  ;;  %v239_v33 = vld [vmem:[%s491_s2] ss:$0 sm:$0xff]  ;;  %v188_v37 = vld [vmem:[#allocation10] sm:$0xff]  ;;  %s401_s2 = smov [#allocation11]  }
  0x22   :  { %173 = vmatpush.msra.mxu1 %v133_v13  ;;  %v189_v38 = vld [vmem:[#allocation10 + $0x8] sm:$0xff]  ;;  %190 = vst [vmem:[#allocation11] sm:$0xff] %v188_v37  ;;  %v194_v41 = vld [vmem:[#allocation8] sm:$0xff]  ;;  %v195_v43 = vld [vmem:[#allocation8 + $0x8] sm:$0xff]  ;;  %s214_s11 = sshll.u32 %s401_s2, 4  ;;  %s215_s11 = int_to_ptr.vmem [resolvable:$true] %s214_s11 }
  0x23   :  { %149 = vmatpush.msra.mxu0 %v116_v10  ;;  %191 = vst [vmem:[#allocation11 + $0x10] sm:$0xff] %v189_v38  ;;  %v240_v39 = vld [vmem:[%s493_s4] ss:$0 sm:$0xff] }
  0x24   :  { %174 = vmatpush.msra.mxu1 %v132_v15  ;;  %v241_v40 = vld [vmem:[%s494_s5] ss:$0 sm:$0xff] }
  0x25   :  { %150 = vmatpush.msra.mxu0 %v115_v12  ;;  %v200_v45 = vmul.f32 %v241_v40, %v194_v41  ;;  %v201_v47 = vmul.f32 %v241_v40, %v195_v43 }
  0x26   :  { %175 = vmatpush.msra.mxu1 %v131_v17 }
  0x27   :  { %151 = vmatpush.msra.mxu0 %v114_v14 }
  0x28   :  { %176 = vmatpush.msra.mxu1 %v130_v19 }
  0x29   :  { %152 = vmatpush.msra.mxu0 %v113_v16 }
  0x2a   :  { %177 = vmatpush.msra.mxu1 %v129_v21 }
  0x2b   :  { %153 = vmatpush.msra.mxu0 %v112_v18 }
  0x2c   :  { %178 = vmatpush.msra.mxu1 %v128_v23 }
  0x2d   :  { %154 = vmatpush.msra.mxu0 %v111_v20 }
  0x2e   :  { %179 = vmatpush.msra.mxu1 %v127_v25 }
  0x2f   :  { %155 = vmatpush.msra.mxu0 %v110_v22 }
  0x30   :  { %180 = vmatpush.msra.mxu1 %v126_v27 }
  0x31   :  { %156 = vmatpush.msra.mxu0 %v109_v24 }
  0x32   :  { %181 = vmatpush.msra.mxu1 %v125_v30 }
  0x33   :  { %157 = vmatpush.msra.mxu0 %v108_v26 }
  0x34   :  { %182 = vmatpush.msra.mxu1 %v124_v31 }
  0x35   :  { %158 = vmatpush.msra.mxu0 %v107_v28 }
  0x36   :  { %159 = vmatmul.f32.vlgmr.msra.gmra.mxu0 %v106_v29  ;;  %183 = vmatpush.msra.mxu1 %v123_v32 }
  0xb3   :  { %v160_v34 = vpop.f32.mrf.mxu0 }
  0xb4   :  { %v161_v35 = vadd.f32 %v239_v33, %v160_v34 }
  0xb6   :  { %v163_v36 = vmax.f32 %v161_v35, 0.0 }
  0xb8   :  { %184 = vmatmul.f32.vlgmr.msra.gmra.mxu1 %v163_v36 }
 0x135   :  { %v185_v42 = vpop.f32.mrf.mxu1 }
 0x136   :  { %v186_v44 = vadd.f32 %v240_v39, %v185_v42 }
 0x138   :  { %v193_v46 = vrot.slane %v186_v44, 1  ;;  %v202_v48 = vperm.slane %v186_v44, 0 }
 0x13a   :  { %v203_v49 = vperm.slane %v193_v46, 0  ;;  %v206_v50 = vadd.f32 %v202_v48, %v200_v45 }
 0x13c   :  { %v207_v51 = vadd.f32 %v203_v49, %v201_v47  ;;  %208 = vst [vmem:[#allocation11 + $0x8] sm:$0xff] %v206_v50 }
 0x13e   :  { %209 = vst [vmem:[#allocation11 + $0x18] sm:$0xff] %v207_v51 }
 0x13f   :  { %222 = dma.vmem_to_hbm [thread:$0]  %s215_s11, 512, %s217_s16, [#allocation4], %s395_s13, %s395_s13, %s396_s14  }
 0x140   :  { %392 = dma.done.wait [#allocation4], 512  }
 0x141   :  { %393 = vsyncadd [#allocation4], 4294966784 }
 0x142   :  { %227 = vsyncpa [#allocation3], 1 }
 0x143   :  { %228 = vsyncpa [#allocation6], 1 }
 0x144   :  { %229 = vsyncpa [#allocation9], 1 }
 0x145   :  { %230 = vsyncpa [#allocation4], 1 }

</bundles_post_ra>
